<compile_context>
chip_gen: v6e
topology: v6e:2x2x1
jax: 0.10.0
libtpu: 0.0.40
codegen_flags: <defaults>
</compile_context>

<pallas_src>
import jax
import jax.numpy as jnp
from jax import lax
from jax.experimental import pallas as pl
from jax.experimental.pallas import tpu as pltpu


def lstm_last_fc_kernel(x_ref, wih_ref, whh_ref, b_ref, wfc_ref, bfc_ref,
                        out_ref, xp_sc):
    """Whole sequence in one kernel call. Gate order (i, f, g, o) as PyTorch."""
    Bp = out_ref.shape[0]                 # padded batch (sublane multiple)
    H = whh_ref.shape[0]
    T = x_ref.shape[0] // Bp              # static trip count

    # All-timestep input projection in one MXU push; bias broadcast added once.
    xp_sc[...] = (jnp.dot(x_ref[...], wih_ref[...],
                          preferred_element_type=jnp.float32)
                  + b_ref[...])                                    # (T*Bp, 4H)

    def step(t, carry):
        h, c = carry
        off = pl.multiple_of(t * Bp, Bp)
        gates = xp_sc[pl.ds(off, Bp), :] + jnp.dot(
            h, whh_ref[...], preferred_element_type=jnp.float32)   # (Bp, 4H)

        # Two full-width EUP launches instead of four partial-width ones.
        sig = jax.nn.sigmoid(gates)
        th = jnp.tanh(gates)
        i_g = sig[:, 0:H]
        f_g = sig[:, H:2 * H]
        g_g = th[:, 2 * H:3 * H]
        o_g = sig[:, 3 * H:4 * H]

        c_new = f_g * c + i_g * g_g
        h_new = o_g * jnp.tanh(c_new)
        return (h_new, c_new)

    h0 = jnp.zeros((Bp, H), jnp.float32)
    c0 = jnp.zeros((Bp, H), jnp.float32)
    h, _ = lax.fori_loop(0, T, step, (h0, c0), unroll=True)

    out_ref[...] = (jnp.dot(h, wfc_ref[...],
                            preferred_element_type=jnp.float32)
                    + bfc_ref[...]).astype(out_ref.dtype)


def pendulum_rnn_forward(x, params):
    """x: (B, T, I) float32 (batch_first, like the PyTorch module)."""
    B, T, I = x.shape
    H = params["w_hh"].shape[1]
    O = params["w_fc"].shape[0]
    Bp = max(8, ((B + 7) // 8) * 8)        # pad batch to f32 sublane multiple

    # Layout prep in plain JAX: time-major, batch-padded, weights pre-transposed.
    x_tm = jnp.transpose(x, (1, 0, 2))                          # (T, B, I)
    x_tm = jnp.pad(x_tm, ((0, 0), (0, Bp - B), (0, 0)))         # (T, Bp, I)
    x_flat = x_tm.reshape(T * Bp, I)                            # (T*Bp, I)
    wih_t = jnp.transpose(params["w_ih"])                       # (I, 4H)
    whh_t = jnp.transpose(params["w_hh"])                       # (H, 4H)
    b = (params["b_ih"] + params["b_hh"])[None, :]              # (1, 4H)
    wfc_t = jnp.transpose(params["w_fc"])                       # (H, O)
    bfc = params["b_fc"][None, :]                               # (1, O)

    grid_spec = pltpu.PrefetchScalarGridSpec(
        num_scalar_prefetch=0,
        grid=(1,),
        in_specs=[
            pl.BlockSpec((T * Bp, I), lambda i: (0, 0)),        # x (time-major)
            pl.BlockSpec((I, 4 * H), lambda i: (0, 0)),         # W_ih^T
            pl.BlockSpec((H, 4 * H), lambda i: (0, 0)),         # W_hh^T
            pl.BlockSpec((1, 4 * H), lambda i: (0, 0)),         # b_ih + b_hh
            pl.BlockSpec((H, O), lambda i: (0, 0)),             # W_fc^T
            pl.BlockSpec((1, O), lambda i: (0, 0)),             # b_fc
        ],
        out_specs=pl.BlockSpec((Bp, O), lambda i: (0, 0)),
        scratch_shapes=[
            pltpu.VMEM((T * Bp, 4 * H), jnp.float32),           # x projection
        ],
    )

    out_p = pl.pallas_call(
        lstm_last_fc_kernel,
        out_shape=jax.ShapeDtypeStruct((Bp, O), jnp.float32),
        grid_spec=grid_spec,
        compiler_params=pltpu.CompilerParams(
            dimension_semantics=("arbitrary",)),
    )(x_flat, wih_t, whh_t, b, wfc_t, bfc)

    return out_p[:B]                       # drop padded batch rows


def init_params(key, input_size, hidden_size, output_size):
    """Deterministic init mirroring PyTorch's U(-1/sqrt(H), 1/sqrt(H))."""
    k = 1.0 / jnp.sqrt(jnp.float32(hidden_size))
    ks = jax.random.split(key, 6)
    u = lambda kk, shape: jax.random.uniform(kk, shape, jnp.float32, -k, k)
    return {
        "w_ih": u(ks[0], (4 * hidden_size, input_size)),
        "w_hh": u(ks[1], (4 * hidden_size, hidden_size)),
        "b_ih": u(ks[2], (4 * hidden_size,)),
        "b_hh": u(ks[3], (4 * hidden_size,)),
        "w_fc": u(ks[4], (output_size, hidden_size)),
        "b_fc": u(ks[5], (output_size,)),
    }


def reference_forward(x, params):
    """Pure-JAX reference (PyTorch LSTM semantics, gate order i,f,g,o)."""
    B, T, I = x.shape
    H = params["w_hh"].shape[1]
    h = jnp.zeros((B, H), jnp.float32)
    c = jnp.zeros((B, H), jnp.float32)
    for t in range(T):
        g = (x[:, t, :] @ params["w_ih"].T + h @ params["w_hh"].T
             + params["b_ih"] + params["b_hh"])
        i_g = jax.nn.sigmoid(g[:, 0:H])
        f_g = jax.nn.sigmoid(g[:, H:2 * H])
        g_g = jnp.tanh(g[:, 2 * H:3 * H])
        o_g = jax.nn.sigmoid(g[:, 3 * H:4 * H])
        c = f_g * c + i_g * g_g
        h = o_g * jnp.tanh(c)
    return h @ params["w_fc"].T + params["b_fc"]


if __name__ == "__main__":
    B, T, I, H, O = 2, 8, 4, 32, 2

    key = jax.random.PRNGKey(0)
    kx, kp = jax.random.split(key)
    x = jax.random.normal(kx, (B, T, I), jnp.float32)
    params = init_params(kp, I, H, O)

    out = pendulum_rnn_forward(x, params)
    out = jax.block_until_ready(out)

    ref = reference_forward(x, params)
    assert out.shape == (B, O)
    assert jnp.allclose(out, ref, atol=1e-5, rtol=1e-5), (out, ref)

    print("KERNEL_OK")
</pallas_src>

<mosaic_0001>
module attributes {stable_mosaic.version = 11 : i64} {
  func.func @lstm_last_fc_kernel(%arg0: i32, %arg1: memref<64x4xf32, #tpu.memory_space<vmem>>, %arg2: memref<4x128xf32, #tpu.memory_space<vmem>>, %arg3: memref<32x128xf32, #tpu.memory_space<vmem>>, %arg4: memref<1x128xf32, #tpu.memory_space<vmem>>, %arg5: memref<32x2xf32, #tpu.memory_space<vmem>>, %arg6: memref<1x2xf32, #tpu.memory_space<vmem>>, %arg7: memref<8x2xf32, #tpu.memory_space<vmem>>, %arg8: memref<64x128xf32, #tpu.memory_space<vmem>>) attributes {dimension_semantics = [#tpu.dimension_semantics<arbitrary>], iteration_bounds = array<i64: 1>, scalar_prefetch = 0 : i64, scratch_operands = 1 : i64, tpu.core_type = #tpu.core_type<tc>, window_params = [{pipeline_mode = #tpu.pipeline_mode<synchronous>, transform_indices = @transform_0, window_bounds = array<i64: 64, 4>}, {pipeline_mode = #tpu.pipeline_mode<synchronous>, transform_indices = @transform_1, window_bounds = array<i64: 4, 128>}, {pipeline_mode = #tpu.pipeline_mode<synchronous>, transform_indices = @transform_2, window_bounds = array<i64: 32, 128>}, {pipeline_mode = #tpu.pipeline_mode<synchronous>, transform_indices = @transform_3, window_bounds = array<i64: 1, 128>}, {pipeline_mode = #tpu.pipeline_mode<synchronous>, transform_indices = @transform_4, window_bounds = array<i64: 32, 2>}, {pipeline_mode = #tpu.pipeline_mode<synchronous>, transform_indices = @transform_5, window_bounds = array<i64: 1, 2>}, {pipeline_mode = #tpu.pipeline_mode<synchronous>, transform_indices = @transform_6, window_bounds = array<i64: 8, 2>}]} {
    %c0 = arith.constant 0 : index
    %c0_0 = arith.constant 0 : index
    %0 = vector.load %arg1[%c0, %c0_0] : memref<64x4xf32, #tpu.memory_space<vmem>>, vector<64x4xf32>
    %c0_1 = arith.constant 0 : index
    %c0_2 = arith.constant 0 : index
    %1 = vector.load %arg2[%c0_1, %c0_2] : memref<4x128xf32, #tpu.memory_space<vmem>>, vector<4x128xf32>
    %cst = arith.constant dense<0.000000e+00> : vector<64x128xf32>
    %2 = tpu.matmul %0, %1, %cst {dimension_numbers = #tpu.dot_dimension_numbers<[1], [0], [0], [1], [0, 0, 1, 1], [], []>} : vector<64x4xf32>, vector<4x128xf32>, vector<64x128xf32> -> vector<64x128xf32>
    %c0_3 = arith.constant 0 : index
    %c0_4 = arith.constant 0 : index
    %3 = vector.load %arg4[%c0_3, %c0_4] : memref<1x128xf32, #tpu.memory_space<vmem>>, vector<1x128xf32>
    %4 = vector.broadcast %3 : vector<1x128xf32> to vector<64x128xf32>
    %5 = arith.addf %2, %4 : vector<64x128xf32>
    %c0_5 = arith.constant 0 : index
    %c0_6 = arith.constant 0 : index
    %6 = vector.load %arg8[%c0_5, %c0_6] : memref<64x128xf32, #tpu.memory_space<vmem>>, vector<64x128xf32>
    tpu.vector_store %arg8[%c0_5, %c0_6], %5 {strides = array<i32>} : memref<64x128xf32, #tpu.memory_space<vmem>>, vector<64x128xf32>,
    %cst_7 = arith.constant 0.000000e+00 : f32
    %7 = vector.broadcast %cst_7 : f32 to vector<8x32xf32>
    %cst_8 = arith.constant 0.000000e+00 : f32
    %8 = vector.broadcast %cst_8 : f32 to vector<8x32xf32>
    %c0_i32 = arith.constant 0 : i32
    %c8_i32 = arith.constant 8 : i32
    %9 = arith.muli %c0_i32, %c8_i32 : i32
    %10 = tpu.assume_multiple %9, 8 : i32
    %11 = arith.index_cast %10 : i32 to index
    %c0_9 = arith.constant 0 : index
    %12 = vector.load %arg8[%11, %c0_9] : memref<64x128xf32, #tpu.memory_space<vmem>>, vector<8x128xf32>
    %c0_10 = arith.constant 0 : index
    %c0_11 = arith.constant 0 : index
    %13 = vector.load %arg3[%c0_10, %c0_11] : memref<32x128xf32, #tpu.memory_space<vmem>>, vector<32x128xf32>
    %cst_12 = arith.constant dense<0.000000e+00> : vector<8x128xf32>
    %14 = tpu.matmul %7, %13, %cst_12 {dimension_numbers = #tpu.dot_dimension_numbers<[1], [0], [0], [1], [0, 0, 1, 1], [], []>} : vector<8x32xf32>, vector<32x128xf32>, vector<8x128xf32> -> vector<8x128xf32>
    %15 = arith.addf %12, %14 : vector<8x128xf32>
    %16 = arith.negf %15 : vector<8x128xf32>
    %17 = math.exp %16 : vector<8x128xf32>
    %cst_13 = arith.constant 1.000000e+00 : f32
    %18 = vector.broadcast %cst_13 : f32 to vector<8x128xf32>
    %19 = arith.addf %18, %17 : vector<8x128xf32>
    %20 = arith.divf %18, %19 : vector<8x128xf32>
    %21 = math.tanh %15 : vector<8x128xf32>
    %22 = vector.extract_strided_slice %20 {offsets = [0, 0], sizes = [8, 32], strides = [1, 1]} : vector<8x128xf32> to vector<8x32xf32>
    %23 = vector.extract_strided_slice %20 {offsets = [0, 32], sizes = [8, 32], strides = [1, 1]} : vector<8x128xf32> to vector<8x32xf32>
    %24 = vector.extract_strided_slice %21 {offsets = [0, 64], sizes = [8, 32], strides = [1, 1]} : vector<8x128xf32> to vector<8x32xf32>
    %25 = vector.extract_strided_slice %20 {offsets = [0, 96], sizes = [8, 32], strides = [1, 1]} : vector<8x128xf32> to vector<8x32xf32>
    %26 = arith.mulf %23, %8 : vector<8x32xf32>
    %27 = arith.mulf %22, %24 : vector<8x32xf32>
    %28 = arith.addf %26, %27 : vector<8x32xf32>
    %29 = math.tanh %28 : vector<8x32xf32>
    %30 = arith.mulf %25, %29 : vector<8x32xf32>
    %c1_i32 = arith.constant 1 : i32
    %c8_i32_14 = arith.constant 8 : i32
    %31 = arith.muli %c1_i32, %c8_i32_14 : i32
    %32 = tpu.assume_multiple %31, 8 : i32
    %33 = arith.index_cast %32 : i32 to index
    %c0_15 = arith.constant 0 : index
    %34 = vector.load %arg8[%33, %c0_15] : memref<64x128xf32, #tpu.memory_space<vmem>>, vector<8x128xf32>
    %c0_16 = arith.constant 0 : index
    %c0_17 = arith.constant 0 : index
    %35 = vector.load %arg3[%c0_16, %c0_17] : memref<32x128xf32, #tpu.memory_space<vmem>>, vector<32x128xf32>
    %cst_18 = arith.constant dense<0.000000e+00> : vector<8x128xf32>
    %36 = tpu.matmul %30, %35, %cst_18 {dimension_numbers = #tpu.dot_dimension_numbers<[1], [0], [0], [1], [0, 0, 1, 1], [], []>} : vector<8x32xf32>, vector<32x128xf32>, vector<8x128xf32> -> vector<8x128xf32>
    %37 = arith.addf %34, %36 : vector<8x128xf32>
    %38 = arith.negf %37 : vector<8x128xf32>
    %39 = math.exp %38 : vector<8x128xf32>
    %cst_19 = arith.constant 1.000000e+00 : f32
    %40 = vector.broadcast %cst_19 : f32 to vector<8x128xf32>
    %41 = arith.addf %40, %39 : vector<8x128xf32>
    %42 = arith.divf %40, %41 : vector<8x128xf32>
    %43 = math.tanh %37 : vector<8x128xf32>
    %44 = vector.extract_strided_slice %42 {offsets = [0, 0], sizes = [8, 32], strides = [1, 1]} : vector<8x128xf32> to vector<8x32xf32>
    %45 = vector.extract_strided_slice %42 {offsets = [0, 32], sizes = [8, 32], strides = [1, 1]} : vector<8x128xf32> to vector<8x32xf32>
    %46 = vector.extract_strided_slice %43 {offsets = [0, 64], sizes = [8, 32], strides = [1, 1]} : vector<8x128xf32> to vector<8x32xf32>
    %47 = vector.extract_strided_slice %42 {offsets = [0, 96], sizes = [8, 32], strides = [1, 1]} : vector<8x128xf32> to vector<8x32xf32>
    %48 = arith.mulf %45, %28 : vector<8x32xf32>
    %49 = arith.mulf %44, %46 : vector<8x32xf32>
    %50 = arith.addf %48, %49 : vector<8x32xf32>
    %51 = math.tanh %50 : vector<8x32xf32>
    %52 = arith.mulf %47, %51 : vector<8x32xf32>
    %c2_i32 = arith.constant 2 : i32
    %c8_i32_20 = arith.constant 8 : i32
    %53 = arith.muli %c2_i32, %c8_i32_20 : i32
    %54 = tpu.assume_multiple %53, 8 : i32
    %55 = arith.index_cast %54 : i32 to index
    %c0_21 = arith.constant 0 : index
    %56 = vector.load %arg8[%55, %c0_21] : memref<64x128xf32, #tpu.memory_space<vmem>>, vector<8x128xf32>
    %c0_22 = arith.constant 0 : index
    %c0_23 = arith.constant 0 : index
    %57 = vector.load %arg3[%c0_22, %c0_23] : memref<32x128xf32, #tpu.memory_space<vmem>>, vector<32x128xf32>
    %cst_24 = arith.constant dense<0.000000e+00> : vector<8x128xf32>
    %58 = tpu.matmul %52, %57, %cst_24 {dimension_numbers = #tpu.dot_dimension_numbers<[1], [0], [0], [1], [0, 0, 1, 1], [], []>} : vector<8x32xf32>, vector<32x128xf32>, vector<8x128xf32> -> vector<8x128xf32>
    %59 = arith.addf %56, %58 : vector<8x128xf32>
    %60 = arith.negf %59 : vector<8x128xf32>
    %61 = math.exp %60 : vector<8x128xf32>
    %cst_25 = arith.constant 1.000000e+00 : f32
    %62 = vector.broadcast %cst_25 : f32 to vector<8x128xf32>
    %63 = arith.addf %62, %61 : vector<8x128xf32>
    %64 = arith.divf %62, %63 : vector<8x128xf32>
    %65 = math.tanh %59 : vector<8x128xf32>
    %66 = vector.extract_strided_slice %64 {offsets = [0, 0], sizes = [8, 32], strides = [1, 1]} : vector<8x128xf32> to vector<8x32xf32>
    %67 = vector.extract_strided_slice %64 {offsets = [0, 32], sizes = [8, 32], strides = [1, 1]} : vector<8x128xf32> to vector<8x32xf32>
    %68 = vector.extract_strided_slice %65 {offsets = [0, 64], sizes = [8, 32], strides = [1, 1]} : vector<8x128xf32> to vector<8x32xf32>
    %69 = vector.extract_strided_slice %64 {offsets = [0, 96], sizes = [8, 32], strides = [1, 1]} : vector<8x128xf32> to vector<8x32xf32>
    %70 = arith.mulf %67, %50 : vector<8x32xf32>
    %71 = arith.mulf %66, %68 : vector<8x32xf32>
    %72 = arith.addf %70, %71 : vector<8x32xf32>
    %73 = math.tanh %72 : vector<8x32xf32>
    %74 = arith.mulf %69, %73 : vector<8x32xf32>
    %c3_i32 = arith.constant 3 : i32
    %c8_i32_26 = arith.constant 8 : i32
    %75 = arith.muli %c3_i32, %c8_i32_26 : i32
    %76 = tpu.assume_multiple %75, 8 : i32
    %77 = arith.index_cast %76 : i32 to index
    %c0_27 = arith.constant 0 : index
    %78 = vector.load %arg8[%77, %c0_27] : memref<64x128xf32, #tpu.memory_space<vmem>>, vector<8x128xf32>
    %c0_28 = arith.constant 0 : index
    %c0_29 = arith.constant 0 : index
    %79 = vector.load %arg3[%c0_28, %c0_29] : memref<32x128xf32, #tpu.memory_space<vmem>>, vector<32x128xf32>
    %cst_30 = arith.constant dense<0.000000e+00> : vector<8x128xf32>
    %80 = tpu.matmul %74, %79, %cst_30 {dimension_numbers = #tpu.dot_dimension_numbers<[1], [0], [0], [1], [0, 0, 1, 1], [], []>} : vector<8x32xf32>, vector<32x128xf32>, vector<8x128xf32> -> vector<8x128xf32>
    %81 = arith.addf %78, %80 : vector<8x128xf32>
    %82 = arith.negf %81 : vector<8x128xf32>
    %83 = math.exp %82 : vector<8x128xf32>
    %cst_31 = arith.constant 1.000000e+00 : f32
    %84 = vector.broadcast %cst_31 : f32 to vector<8x128xf32>
    %85 = arith.addf %84, %83 : vector<8x128xf32>
    %86 = arith.divf %84, %85 : vector<8x128xf32>
    %87 = math.tanh %81 : vector<8x128xf32>
    %88 = vector.extract_strided_slice %86 {offsets = [0, 0], sizes = [8, 32], strides = [1, 1]} : vector<8x128xf32> to vector<8x32xf32>
    %89 = vector.extract_strided_slice %86 {offsets = [0, 32], sizes = [8, 32], strides = [1, 1]} : vector<8x128xf32> to vector<8x32xf32>
    %90 = vector.extract_strided_slice %87 {offsets = [0, 64], sizes = [8, 32], strides = [1, 1]} : vector<8x128xf32> to vector<8x32xf32>
    %91 = vector.extract_strided_slice %86 {offsets = [0, 96], sizes = [8, 32], strides = [1, 1]} : vector<8x128xf32> to vector<8x32xf32>
    %92 = arith.mulf %89, %72 : vector<8x32xf32>
    %93 = arith.mulf %88, %90 : vector<8x32xf32>
    %94 = arith.addf %92, %93 : vector<8x32xf32>
    %95 = math.tanh %94 : vector<8x32xf32>
    %96 = arith.mulf %91, %95 : vector<8x32xf32>
    %c4_i32 = arith.constant 4 : i32
    %c8_i32_32 = arith.constant 8 : i32
    %97 = arith.muli %c4_i32, %c8_i32_32 : i32
    %98 = tpu.assume_multiple %97, 8 : i32
    %99 = arith.index_cast %98 : i32 to index
    %c0_33 = arith.constant 0 : index
    %100 = vector.load %arg8[%99, %c0_33] : memref<64x128xf32, #tpu.memory_space<vmem>>, vector<8x128xf32>
    %c0_34 = arith.constant 0 : index
    %c0_35 = arith.constant 0 : index
    %101 = vector.load %arg3[%c0_34, %c0_35] : memref<32x128xf32, #tpu.memory_space<vmem>>, vector<32x128xf32>
    %cst_36 = arith.constant dense<0.000000e+00> : vector<8x128xf32>
    %102 = tpu.matmul %96, %101, %cst_36 {dimension_numbers = #tpu.dot_dimension_numbers<[1], [0], [0], [1], [0, 0, 1, 1], [], []>} : vector<8x32xf32>, vector<32x128xf32>, vector<8x128xf32> -> vector<8x128xf32>
    %103 = arith.addf %100, %102 : vector<8x128xf32>
    %104 = arith.negf %103 : vector<8x128xf32>
    %105 = math.exp %104 : vector<8x128xf32>
    %cst_37 = arith.constant 1.000000e+00 : f32
    %106 = vector.broadcast %cst_37 : f32 to vector<8x128xf32>
    %107 = arith.addf %106, %105 : vector<8x128xf32>
    %108 = arith.divf %106, %107 : vector<8x128xf32>
    %109 = math.tanh %103 : vector<8x128xf32>
    %110 = vector.extract_strided_slice %108 {offsets = [0, 0], sizes = [8, 32], strides = [1, 1]} : vector<8x128xf32> to vector<8x32xf32>
    %111 = vector.extract_strided_slice %108 {offsets = [0, 32], sizes = [8, 32], strides = [1, 1]} : vector<8x128xf32> to vector<8x32xf32>
    %112 = vector.extract_strided_slice %109 {offsets = [0, 64], sizes = [8, 32], strides = [1, 1]} : vector<8x128xf32> to vector<8x32xf32>
    %113 = vector.extract_strided_slice %108 {offsets = [0, 96], sizes = [8, 32], strides = [1, 1]} : vector<8x128xf32> to vector<8x32xf32>
    %114 = arith.mulf %111, %94 : vector<8x32xf32>
    %115 = arith.mulf %110, %112 : vector<8x32xf32>
    %116 = arith.addf %114, %115 : vector<8x32xf32>
    %117 = math.tanh %116 : vector<8x32xf32>
    %118 = arith.mulf %113, %117 : vector<8x32xf32>
    %c5_i32 = arith.constant 5 : i32
    %c8_i32_38 = arith.constant 8 : i32
    %119 = arith.muli %c5_i32, %c8_i32_38 : i32
    %120 = tpu.assume_multiple %119, 8 : i32
    %121 = arith.index_cast %120 : i32 to index
    %c0_39 = arith.constant 0 : index
    %122 = vector.load %arg8[%121, %c0_39] : memref<64x128xf32, #tpu.memory_space<vmem>>, vector<8x128xf32>
    %c0_40 = arith.constant 0 : index
    %c0_41 = arith.constant 0 : index
    %123 = vector.load %arg3[%c0_40, %c0_41] : memref<32x128xf32, #tpu.memory_space<vmem>>, vector<32x128xf32>
    %cst_42 = arith.constant dense<0.000000e+00> : vector<8x128xf32>
    %124 = tpu.matmul %118, %123, %cst_42 {dimension_numbers = #tpu.dot_dimension_numbers<[1], [0], [0], [1], [0, 0, 1, 1], [], []>} : vector<8x32xf32>, vector<32x128xf32>, vector<8x128xf32> -> vector<8x128xf32>
    %125 = arith.addf %122, %124 : vector<8x128xf32>
    %126 = arith.negf %125 : vector<8x128xf32>
    %127 = math.exp %126 : vector<8x128xf32>
    %cst_43 = arith.constant 1.000000e+00 : f32
    %128 = vector.broadcast %cst_43 : f32 to vector<8x128xf32>
    %129 = arith.addf %128, %127 : vector<8x128xf32>
    %130 = arith.divf %128, %129 : vector<8x128xf32>
    %131 = math.tanh %125 : vector<8x128xf32>
    %132 = vector.extract_strided_slice %130 {offsets = [0, 0], sizes = [8, 32], strides = [1, 1]} : vector<8x128xf32> to vector<8x32xf32>
    %133 = vector.extract_strided_slice %130 {offsets = [0, 32], sizes = [8, 32], strides = [1, 1]} : vector<8x128xf32> to vector<8x32xf32>
    %134 = vector.extract_strided_slice %131 {offsets = [0, 64], sizes = [8, 32], strides = [1, 1]} : vector<8x128xf32> to vector<8x32xf32>
    %135 = vector.extract_strided_slice %130 {offsets = [0, 96], sizes = [8, 32], strides = [1, 1]} : vector<8x128xf32> to vector<8x32xf32>
    %136 = arith.mulf %133, %116 : vector<8x32xf32>
    %137 = arith.mulf %132, %134 : vector<8x32xf32>
    %138 = arith.addf %136, %137 : vector<8x32xf32>
    %139 = math.tanh %138 : vector<8x32xf32>
    %140 = arith.mulf %135, %139 : vector<8x32xf32>
    %c6_i32 = arith.constant 6 : i32
    %c8_i32_44 = arith.constant 8 : i32
    %141 = arith.muli %c6_i32, %c8_i32_44 : i32
    %142 = tpu.assume_multiple %141, 8 : i32
    %143 = arith.index_cast %142 : i32 to index
    %c0_45 = arith.constant 0 : index
    %144 = vector.load %arg8[%143, %c0_45] : memref<64x128xf32, #tpu.memory_space<vmem>>, vector<8x128xf32>
    %c0_46 = arith.constant 0 : index
    %c0_47 = arith.constant 0 : index
    %145 = vector.load %arg3[%c0_46, %c0_47] : memref<32x128xf32, #tpu.memory_space<vmem>>, vector<32x128xf32>
    %cst_48 = arith.constant dense<0.000000e+00> : vector<8x128xf32>
    %146 = tpu.matmul %140, %145, %cst_48 {dimension_numbers = #tpu.dot_dimension_numbers<[1], [0], [0], [1], [0, 0, 1, 1], [], []>} : vector<8x32xf32>, vector<32x128xf32>, vector<8x128xf32> -> vector<8x128xf32>
    %147 = arith.addf %144, %146 : vector<8x128xf32>
    %148 = arith.negf %147 : vector<8x128xf32>
    %149 = math.exp %148 : vector<8x128xf32>
    %cst_49 = arith.constant 1.000000e+00 : f32
    %150 = vector.broadcast %cst_49 : f32 to vector<8x128xf32>
    %151 = arith.addf %150, %149 : vector<8x128xf32>
    %152 = arith.divf %150, %151 : vector<8x128xf32>
    %153 = math.tanh %147 : vector<8x128xf32>
    %154 = vector.extract_strided_slice %152 {offsets = [0, 0], sizes = [8, 32], strides = [1, 1]} : vector<8x128xf32> to vector<8x32xf32>
    %155 = vector.extract_strided_slice %152 {offsets = [0, 32], sizes = [8, 32], strides = [1, 1]} : vector<8x128xf32> to vector<8x32xf32>
    %156 = vector.extract_strided_slice %153 {offsets = [0, 64], sizes = [8, 32], strides = [1, 1]} : vector<8x128xf32> to vector<8x32xf32>
    %157 = vector.extract_strided_slice %152 {offsets = [0, 96], sizes = [8, 32], strides = [1, 1]} : vector<8x128xf32> to vector<8x32xf32>
    %158 = arith.mulf %155, %138 : vector<8x32xf32>
    %159 = arith.mulf %154, %156 : vector<8x32xf32>
    %160 = arith.addf %158, %159 : vector<8x32xf32>
    %161 = math.tanh %160 : vector<8x32xf32>
    %162 = arith.mulf %157, %161 : vector<8x32xf32>
    %c7_i32 = arith.constant 7 : i32
    %c8_i32_50 = arith.constant 8 : i32
    %163 = arith.muli %c7_i32, %c8_i32_50 : i32
    %164 = tpu.assume_multiple %163, 8 : i32
    %165 = arith.index_cast %164 : i32 to index
    %c0_51 = arith.constant 0 : index
    %166 = vector.load %arg8[%165, %c0_51] : memref<64x128xf32, #tpu.memory_space<vmem>>, vector<8x128xf32>
    %c0_52 = arith.constant 0 : index
    %c0_53 = arith.constant 0 : index
    %167 = vector.load %arg3[%c0_52, %c0_53] : memref<32x128xf32, #tpu.memory_space<vmem>>, vector<32x128xf32>
    %cst_54 = arith.constant dense<0.000000e+00> : vector<8x128xf32>
    %168 = tpu.matmul %162, %167, %cst_54 {dimension_numbers = #tpu.dot_dimension_numbers<[1], [0], [0], [1], [0, 0, 1, 1], [], []>} : vector<8x32xf32>, vector<32x128xf32>, vector<8x128xf32> -> vector<8x128xf32>
    %169 = arith.addf %166, %168 : vector<8x128xf32>
    %170 = arith.negf %169 : vector<8x128xf32>
    %171 = math.exp %170 : vector<8x128xf32>
    %cst_55 = arith.constant 1.000000e+00 : f32
    %172 = vector.broadcast %cst_55 : f32 to vector<8x128xf32>
    %173 = arith.addf %172, %171 : vector<8x128xf32>
    %174 = arith.divf %172, %173 : vector<8x128xf32>
    %175 = math.tanh %169 : vector<8x128xf32>
    %176 = vector.extract_strided_slice %174 {offsets = [0, 0], sizes = [8, 32], strides = [1, 1]} : vector<8x128xf32> to vector<8x32xf32>
    %177 = vector.extract_strided_slice %174 {offsets = [0, 32], sizes = [8, 32], strides = [1, 1]} : vector<8x128xf32> to vector<8x32xf32>
    %178 = vector.extract_strided_slice %175 {offsets = [0, 64], sizes = [8, 32], strides = [1, 1]} : vector<8x128xf32> to vector<8x32xf32>
    %179 = vector.extract_strided_slice %174 {offsets = [0, 96], sizes = [8, 32], strides = [1, 1]} : vector<8x128xf32> to vector<8x32xf32>
    %180 = arith.mulf %177, %160 : vector<8x32xf32>
    %181 = arith.mulf %176, %178 : vector<8x32xf32>
    %182 = arith.addf %180, %181 : vector<8x32xf32>
    %183 = math.tanh %182 : vector<8x32xf32>
    %184 = arith.mulf %179, %183 : vector<8x32xf32>
    %c8_i32_56 = arith.constant 8 : i32
    %c0_57 = arith.constant 0 : index
    %c0_58 = arith.constant 0 : index
    %185 = vector.load %arg5[%c0_57, %c0_58] : memref<32x2xf32, #tpu.memory_space<vmem>>, vector<32x2xf32>
    %cst_59 = arith.constant dense<0.000000e+00> : vector<8x2xf32>
    %186 = tpu.matmul %184, %185, %cst_59 {dimension_numbers = #tpu.dot_dimension_numbers<[1], [0], [0], [1], [0, 0, 1, 1], [], []>} : vector<8x32xf32>, vector<32x2xf32>, vector<8x2xf32> -> vector<8x2xf32>
    %c0_60 = arith.constant 0 : index
    %c0_61 = arith.constant 0 : index
    %187 = vector.load %arg6[%c0_60, %c0_61] : memref<1x2xf32, #tpu.memory_space<vmem>>, vector<1x2xf32>
    %188 = vector.broadcast %187 : vector<1x2xf32> to vector<8x2xf32>
    %189 = arith.addf %186, %188 : vector<8x2xf32>
    %c0_62 = arith.constant 0 : index
    %c0_63 = arith.constant 0 : index
    %190 = vector.load %arg7[%c0_62, %c0_63] : memref<8x2xf32, #tpu.memory_space<vmem>>, vector<8x2xf32>
    tpu.vector_store %arg7[%c0_62, %c0_63], %189 {strides = array<i32>} : memref<8x2xf32, #tpu.memory_space<vmem>>, vector<8x2xf32>,
    return
  }
  func.func @transform_0(%arg0: i32) -> (i32, i32) {
    %c0_i32 = arith.constant 0 : i32
    %c0_i32_0 = arith.constant 0 : i32
    %c0_i32_1 = arith.constant 0 : i32
    return %c0_i32, %c0_i32_0 : i32, i32
  }
  func.func @transform_1(%arg0: i32) -> (i32, i32) {
    %c0_i32 = arith.constant 0 : i32
    %c0_i32_0 = arith.constant 0 : i32
    %c0_i32_1 = arith.constant 0 : i32
    return %c0_i32, %c0_i32_0 : i32, i32
  }
  func.func @transform_2(%arg0: i32) -> (i32, i32) {
    %c0_i32 = arith.constant 0 : i32
    %c0_i32_0 = arith.constant 0 : i32
    %c0_i32_1 = arith.constant 0 : i32
    return %c0_i32, %c0_i32_0 : i32, i32
  }
  func.func @transform_3(%arg0: i32) -> (i32, i32) {
    %c0_i32 = arith.constant 0 : i32
    %c0_i32_0 = arith.constant 0 : i32
    %c0_i32_1 = arith.constant 0 : i32
    return %c0_i32, %c0_i32_0 : i32, i32
  }
  func.func @transform_4(%arg0: i32) -> (i32, i32) {
    %c0_i32 = arith.constant 0 : i32
    %c0_i32_0 = arith.constant 0 : i32
    %c0_i32_1 = arith.constant 0 : i32
    return %c0_i32, %c0_i32_0 : i32, i32
  }
  func.func @transform_5(%arg0: i32) -> (i32, i32) {
    %c0_i32 = arith.constant 0 : i32
    %c0_i32_0 = arith.constant 0 : i32
    %c0_i32_1 = arith.constant 0 : i32
    return %c0_i32, %c0_i32_0 : i32, i32
  }
  func.func @transform_6(%arg0: i32) -> (i32, i32) {
    %c0_i32 = arith.constant 0 : i32
    %c0_i32_0 = arith.constant 0 : i32
    %c0_i32_1 = arith.constant 0 : i32
    return %c0_i32, %c0_i32_0 : i32, i32
  }
}

</mosaic_0001>

<bundles_post_ra>
// kernel: tpu_custom_call.1
= control target key start
LH: loop header
LB: loop body
LE: loop exit
PB: predicated region body
PF: predicated region fallthrough
CT: control target
= control target key end

     0   :  { %vm64_vm0 = vcmask 1043456   ;;  %vm39_vm1 = vcmask 31744   ;;  %v1353_v0 = vmov 0.0   ;;  %vm1354_vm2 = vmmov 0   ;;  %s1355_s11 = smov 64   ;;  %s1617_s1 = inlined_call_operand.vmem [shape: f32[4,128], index: 1, kind: input, shape index: {}]   ;;  %s1618_s2 = inlined_call_operand.vmem [shape: f32[32,128], index: 2, kind: input, shape index: {}]   ;;  %s1619_s0 = inlined_call_operand.vmem [shape: f32[64,4], index: 0, kind: input, shape index: {}]   ;;  %s1620_s3 = inlined_call_operand.vmem [shape: f32[1,128], index: 3, kind: input, shape index: {}]   ;;  %s1621_s4 = inlined_call_operand.vmem [shape: f32[32,2], index: 4, kind: input, shape index: {}]   ;;  %s1622_s5 = inlined_call_operand.vmem [shape: f32[1,2], index: 5, kind: input, shape index: {}]   ;;  %s1623_s6 = inlined_call_operand.vmem [shape: f32[8,2], index: 6, kind: output, shape index: {}]  }
   0x1   :  { %1186 = vmatprep.subr.mxu1 %v1353_v0  ;;  %v31_v1 = vld [vmem:[%s1617_s1] sm:$0xf]  ;;  %v1399_v2 = vld [vmem:[%s1618_s2 + $0x18] sm:$0xff]  ;;  %1194 = vmatprep.mubr.msk.f32.mxu1 %vm1354_vm2, %v1353_v0  ;;  %v24_v4 = vld [vmem:[%s1619_s0 + $0x8] sm:$0xff]  ;;  %vm186_vm3 = vcmask 261120   ;;  %vm1085_vm4 = vcmask 15360  }
   0x2   :  { %v23_v3 = vld [vmem:[%s1619_s0] sm:$0xff]  ;;  %1172 = vmatprep.subr.msk.mxu0 %vm64_vm0, %v31_v1  ;;  %1187 = vmatpush3.msra.mxu1 %v1399_v2  ;;  %v1413_v5 = vld [vmem:[%s1618_s2 + $0x10] sm:$0xff]  ;;  %v1421_v6 = vld [vmem:[%s1618_s2 + $0x8] sm:$0xff] }
   0x3   :  { %1173 = vmatpush3.msk.msra.mxu0 %vm64_vm0, %v31_v1  ;;  %1174 = vmatprep.mubr.msk.f32.mxu0 %vm39_vm1, %v23_v3  ;;  %v1429_v7 = vld [vmem:[%s1618_s2] sm:$0xff]  ;;  %v25_v43 = vld [vmem:[%s1619_s0 + $0x10] sm:$0xff]  ;;  %v26_v44 = vld [vmem:[%s1619_s0 + $0x18] sm:$0xff] }
   0x4   :  { %1188 = vmatprep.subr.mxu1 %v1353_v0  ;;  %1175 = vmatmul.mubr.msk.f32.vlgmr.msra.gmra.mxu0 %vm39_vm1, %v24_v4  ;;  %v1457_v9 = vld [vmem:[%s1620_s3] ss:$0 sm:$0xff]  ;;  %s1356_s3 = smov 32   ;;  %v28_v46 = vld [vmem:[%s1619_s0 + $0x28] sm:$0xff]  ;;  %v29_v47 = vld [vmem:[%s1619_s0 + $0x30] sm:$0xff] }
   0x5   :  { %1189 = vmatpush3.msra.mxu1 %v1413_v5  ;;  %1208 = vmatprep.subr.mxu0 %v1353_v0  ;;  %v27_v45 = vld [vmem:[%s1619_s0 + $0x20] sm:$0xff]  ;;  %v30_v48 = vld [vmem:[%s1619_s0 + $0x38] sm:$0xff] }
   0x6   :  { %1190 = vmatprep.subr.mxu1 %v1353_v0  ;;  %1209 = vmatpush3.msra.mxu0 %v1399_v2 }
   0x7   :  { %1191 = vmatpush3.msra.mxu1 %v1421_v6  ;;  %1210 = vmatprep.subr.mxu0 %v1353_v0 }
   0x8   :  { %1192 = vmatprep.subr.mxu1 %v1353_v0  ;;  %1211 = vmatpush3.msra.mxu0 %v1413_v5 }
   0x9   :  { %1193 = vmatpush3.msra.mxu1 %v1429_v7  ;;  %1212 = vmatprep.subr.mxu0 %v1353_v0 }
   0xa   :  { %1195 = vmatmul.mubr.f32.vlgmr.msra.gmra.mxu1 %v1353_v0  ;;  %1197 = vmatprep.subr.mxu1 %v1353_v0 }
   0xb   :  { %1198 = vmatpush3.msra.mxu1 %v1399_v2  ;;  %1205 = vmatprep.mubr.msk.f32.mxu1 %vm1354_vm2, %v1353_v0 }
   0xc   :  { %1199 = vmatprep.subr.mxu1 %v1353_v0  ;;  %1213 = vmatpush3.msra.mxu0 %v1421_v6 }
   0xd   :  { %1200 = vmatpush3.msra.mxu1 %v1413_v5  ;;  %1214 = vmatprep.subr.mxu0 %v1353_v0 }
   0xe   :  { %1201 = vmatprep.subr.mxu1 %v1353_v0  ;;  %1215 = vmatpush3.msra.mxu0 %v1429_v7 }
   0xf   :  { %1202 = vmatpush3.msra.mxu1 %v1421_v6  ;;  %1230 = vmatprep.subr.mxu0 %v1353_v0 }
  0x10   :  { %1203 = vmatprep.subr.mxu1 %v1353_v0  ;;  %1177 = vmatprep.mubr.msk.f32.mxu0 %vm39_vm1, %v25_v43 }
  0x11   :  { %1204 = vmatpush3.msra.mxu1 %v1429_v7  ;;  %1178 = vmatmul.mubr.msk.f32.gmra.mxu0 %vm39_vm1, %v26_v44 }
  0x12   :  { %1219 = vmatprep.subr.mxu1 %v1353_v0  ;;  %1180 = vmatprep.mubr.msk.f32.mxu0 %vm39_vm1, %v27_v45 }
  0x15   :  { %1181 = vmatmul.mubr.msk.f32.gmra.mxu0 %vm39_vm1, %v28_v46 }
  0x16   :  { %1183 = vmatprep.mubr.msk.f32.mxu0 %vm39_vm1, %v29_v47 }
  0x19   :  { %1184 = vmatmul.mubr.msk.f32.gmra.mxu0 %vm39_vm1, %v30_v48 }
  0x1a   :  { %1216 = vmatprep.mubr.msk.f32.mxu0 %vm1354_vm2, %v1353_v0 }
  0xc4   :  { %v1176_v8 = vpop.f32.mrf.mxu0 }
  0xc5   :  { %v140_v29 = vadd.f32 %v1176_v8, %v1457_v9 }
  0xc6   :  { %v134_v10 = vpop.f32.mrf.mxu0 }
  0xc7   :  { %v135_v11 = vadd.f32 %v1457_v9, %v134_v10 }
  0xca   :  { %v256_v12 = vpop.f32.mrf.mxu1 }
  0xcb   :  { %v260_v13 = vadd.f32 %v256_v12, %v135_v11 }
  0xcc   :  { %v1196_v14 = vpop.f32.mrf.mxu1 }
  0xcd   :  { %1289 = vtanh.f32 %v260_v13  ;;  %v1101_v16 = vmul.f32 -1.442695, %v260_v13 }
  0xcf   :  { %1291 = vpow2.f32 %v1101_v16 }
  0xd1   :  { %v1179_v53 = vpop.f32.mrf.mxu0 }
  0xd3   :  { %v144_v54 = vpop.f32.mrf.mxu0 }
  0xd4   :  { %v145_v59 = vadd.f32 %v1457_v9, %v144_v54 }
  0xd5   :  { %v1517_v55 = vpop.f32.mrf.mxu0 }
  0xd7   :  { %v1519_v56 = vpop.f32.mrf.mxu0 }
  0xd9   :  { %v1521_v57 = vpop.f32.mrf.mxu0 }
  0xda   :  { %v1290_v15 = vpop.eup %1289 }
  0xdb   :  { %270 = vrot.lane.b32.xlu0 %v1290_v15, %s1355_s11  ;;  %v1523_v58 = vpop.f32.mrf.mxu0 }
  0xdc   :  { %v1292_v17 = vpop.eup %1291 }
  0xdd   :  { %v264_v18 = vadd.f32 1.0, %v1292_v17 }
  0xdf   :  { %1293 = vrcp.f32 %v264_v18 }
  0xec   :  { %v1294_v19 = vpop.eup %1293 }
  0xed   :  { %v268_v22 = vmul.f32 0.0, %v1294_v19 }
 0x14d   :  { %v271_v20 = vpop.permute.xlu0 %270 }
 0x14e   :  { %v273_v21 = vmul.f32 %v1294_v19, %v271_v20 }
 0x150   :  { %275 = vrot.lane.b32.xlu0 %v273_v21, %s1356_s3 }
 0x1c2   :  { %v276_v23 = vpop.permute.xlu0 %275 }
 0x1c3   :  { %v278_v24 = vadd.f32 %v276_v23, %v268_v22 }
 0x1c5   :  { %1295 = vtanh.f32 %v278_v24 }
 0x1d2   :  { %v1296_v25 = vpop.eup %1295 }
 0x1d3   :  { %281 = vrot.lane.b32.xlu1 %v1296_v25, %s1355_s11 }
 0x245   :  { %v282_v26 = vpop.permute.xlu1 %281 }
 0x246   :  { %v284_v27 = vmul.f32 %v1294_v19, %v282_v26  ;;  %v150_v19 = vadd.f32 %v1179_v53, %v1457_v9 }
 0x248   :  { %288 = vrot.lane.b32.xlu1 %v284_v27, %s1356_s3 }
 0x2ba   :  { %v289_v28 = vpop.permute.xlu1 %288 }
 0x2bb   :  { %1206 = vmatmul.mubr.msk.f32.vlgmr.msra.gmra.mxu1 %vm186_vm3, %v289_v28 }
 0x2bc   :  { %1220 = vmatpush3.msra.mxu1 %v1399_v2  ;;  %1227 = vmatprep.mubr.msk.f32.mxu1 %vm1354_vm2, %v1353_v0 }
 0x2bd   :  { %1221 = vmatprep.subr.mxu1 %v1353_v0 }
 0x2be   :  { %1222 = vmatpush3.msra.mxu1 %v1413_v5 }
 0x2bf   :  { %1223 = vmatprep.subr.mxu1 %v1353_v0 }
 0x2c0   :  { %1224 = vmatpush3.msra.mxu1 %v1421_v6 }
 0x2c1   :  { %1225 = vmatprep.subr.mxu1 %v1353_v0 }
 0x2c2   :  { %1226 = vmatpush3.msra.mxu1 %v1429_v7 }
 0x2c3   :  { %1241 = vmatprep.subr.mxu1 %v1353_v0 }
 0x37b   :  { %v358_v30 = vpop.f32.mrf.mxu1 }
 0x37c   :  { %v362_v31 = vadd.f32 %v358_v30, %v140_v29 }
 0x37d   :  { %v1207_v32 = vpop.f32.mrf.mxu1 }
 0x37e   :  { %1297 = vtanh.f32 %v362_v31  ;;  %v1103_v34 = vmul.f32 -1.442695, %v362_v31 }
 0x380   :  { %1299 = vpow2.f32 %v1103_v34 }
 0x38b   :  { %v1298_v33 = vpop.eup %1297 }
 0x38c   :  { %372 = vrot.lane.b32.xlu0 %v1298_v33, %s1355_s11 }
 0x38d   :  { %v1300_v35 = vpop.eup %1299 }
 0x38e   :  { %v366_v36 = vadd.f32 1.0, %v1300_v35 }
 0x390   :  { %1301 = vrcp.f32 %v366_v36 }
 0x39d   :  { %v1302_v37 = vpop.eup %1301 }
 0x39e   :  { %v370_v40 = vmul.f32 %v1302_v37, %v278_v24 }
 0x3fe   :  { %v373_v38 = vpop.permute.xlu0 %372 }
 0x3ff   :  { %v375_v39 = vmul.f32 %v1302_v37, %v373_v38 }
 0x401   :  { %377 = vrot.lane.b32.xlu1 %v375_v39, %s1356_s3 }
 0x473   :  { %v378_v41 = vpop.permute.xlu1 %377 }
 0x474   :  { %v380_v42 = vadd.f32 %v378_v41, %v370_v40 }
 0x476   :  { %1303 = vtanh.f32 %v380_v42 }
 0x483   :  { %v1304_v49 = vpop.eup %1303 }
 0x484   :  { %383 = vrot.lane.b32.xlu0 %v1304_v49, %s1355_s11 }
 0x4f6   :  { %v384_v50 = vpop.permute.xlu0 %383 }
 0x4f7   :  { %v386_v51 = vmul.f32 %v1302_v37, %v384_v50  ;;  %v155_v37 = vadd.f32 %v1457_v9, %v1519_v56  ;;  %v160_v56 = vadd.f32 %v1517_v55, %v1457_v9 }
 0x4f9   :  { %390 = vrot.lane.b32.xlu1 %v386_v51, %s1356_s3 }
 0x56b   :  { %v391_v52 = vpop.permute.xlu1 %390 }
 0x56c   :  { %1217 = vmatmul.mubr.msk.f32.vlgmr.msra.gmra.mxu0 %vm186_vm3, %v391_v52 }
 0x56d   :  { %1231 = vmatpush3.msra.mxu0 %v1399_v2  ;;  %1238 = vmatprep.mubr.msk.f32.mxu0 %vm1354_vm2, %v1353_v0 }
 0x56e   :  { %1232 = vmatprep.subr.mxu0 %v1353_v0 }
 0x56f   :  { %1233 = vmatpush3.msra.mxu0 %v1413_v5 }
 0x570   :  { %1234 = vmatprep.subr.mxu0 %v1353_v0 }
 0x571   :  { %1235 = vmatpush3.msra.mxu0 %v1421_v6 }
 0x572   :  { %1236 = vmatprep.subr.mxu0 %v1353_v0 }
 0x573   :  { %1237 = vmatpush3.msra.mxu0 %v1429_v7 }
 0x574   :  { %1252 = vmatprep.subr.mxu0 %v1353_v0 }
 0x62c   :  { %v460_v60 = vpop.f32.mrf.mxu0 }
 0x62d   :  { %v464_v61 = vadd.f32 %v460_v60, %v145_v59 }
 0x62e   :  { %v1218_v62 = vpop.f32.mrf.mxu0 }
 0x62f   :  { %1305 = vtanh.f32 %v464_v61  ;;  %v1105_v1 = vmul.f32 -1.442695, %v464_v61 }
 0x631   :  { %1307 = vpow2.f32 %v1105_v1 }
 0x63c   :  { %v1306_v63 = vpop.eup %1305 }
 0x63d   :  { %474 = vrot.lane.b32.xlu0 %v1306_v63, %s1355_s11 }
 0x63e   :  { %v1308_v3 = vpop.eup %1307 }
 0x63f   :  { %v468_v4 = vadd.f32 1.0, %v1308_v3 }
 0x641   :  { %1309 = vrcp.f32 %v468_v4 }
 0x64e   :  { %v1310_v8 = vpop.eup %1309 }
 0x64f   :  { %v472_v12 = vmul.f32 %v1310_v8, %v380_v42 }
 0x6af   :  { %v475_v10 = vpop.permute.xlu0 %474 }
 0x6b0   :  { %v477_v11 = vmul.f32 %v1310_v8, %v475_v10 }
 0x6b2   :  { %479 = vrot.lane.b32.xlu1 %v477_v11, %s1356_s3 }
 0x724   :  { %v480_v13 = vpop.permute.xlu1 %479 }
 0x725   :  { %v482_v14 = vadd.f32 %v480_v13, %v472_v12  ;;  %v165_v13 = vadd.f32 %v1457_v9, %v1523_v58 }
 0x727   :  { %1311 = vtanh.f32 %v482_v14 }
 0x734   :  { %v1312_v15 = vpop.eup %1311 }
 0x735   :  { %485 = vrot.lane.b32.xlu0 %v1312_v15, %s1355_s11 }
 0x7a7   :  { %v486_v16 = vpop.permute.xlu0 %485 }
 0x7a8   :  { %v488_v17 = vmul.f32 %v1310_v8, %v486_v16 }
 0x7aa   :  { %492 = vrot.lane.b32.xlu1 %v488_v17, %s1356_s3 }
 0x81c   :  { %v493_v18 = vpop.permute.xlu1 %492 }
 0x81d   :  { %1228 = vmatmul.mubr.msk.f32.vlgmr.msra.gmra.mxu1 %vm186_vm3, %v493_v18 }
 0x81e   :  { %1242 = vmatpush3.msra.mxu1 %v1399_v2  ;;  %1249 = vmatprep.mubr.msk.f32.mxu1 %vm1354_vm2, %v1353_v0 }
 0x81f   :  { %1243 = vmatprep.subr.mxu1 %v1353_v0 }
 0x820   :  { %1244 = vmatpush3.msra.mxu1 %v1413_v5 }
 0x821   :  { %1245 = vmatprep.subr.mxu1 %v1353_v0 }
 0x822   :  { %1246 = vmatpush3.msra.mxu1 %v1421_v6 }
 0x823   :  { %1247 = vmatprep.subr.mxu1 %v1353_v0 }
 0x824   :  { %1248 = vmatpush3.msra.mxu1 %v1429_v7 }
 0x825   :  { %1263 = vmatprep.subr.mxu1 %v1353_v0 }
 0x8dd   :  { %v562_v20 = vpop.f32.mrf.mxu1 }
 0x8de   :  { %v566_v21 = vadd.f32 %v562_v20, %v150_v19 }
 0x8df   :  { %v1229_v22 = vpop.f32.mrf.mxu1 }
 0x8e0   :  { %1313 = vtanh.f32 %v566_v21  ;;  %v1107_v24 = vmul.f32 -1.442695, %v566_v21 }
 0x8e2   :  { %1315 = vpow2.f32 %v1107_v24 }
 0x8ed   :  { %v1314_v23 = vpop.eup %1313 }
 0x8ee   :  { %576 = vrot.lane.b32.xlu0 %v1314_v23, %s1355_s11 }
 0x8ef   :  { %v1316_v25 = vpop.eup %1315 }
 0x8f0   :  { %v570_v26 = vadd.f32 1.0, %v1316_v25 }
 0x8f2   :  { %1317 = vrcp.f32 %v570_v26 }
 0x8ff   :  { %v1318_v27 = vpop.eup %1317 }
 0x900   :  { %v574_v30 = vmul.f32 %v1318_v27, %v482_v14 }
 0x960   :  { %v577_v28 = vpop.permute.xlu0 %576 }
 0x961   :  { %v579_v29 = vmul.f32 %v1318_v27, %v577_v28 }
 0x963   :  { %581 = vrot.lane.b32.xlu1 %v579_v29, %s1356_s3 }
 0x9d5   :  { %v582_v31 = vpop.permute.xlu1 %581 }
 0x9d6   :  { %v584_v32 = vadd.f32 %v582_v31, %v574_v30  ;;  %v170_v30 = vadd.f32 %v1521_v57, %v1457_v9  ;;  %v1002_v57 = vld [vmem:[%s1621_s4 + $0x18] sm:$0xff] }
 0x9d8   :  { %1319 = vtanh.f32 %v584_v32 }
 0x9e5   :  { %v1320_v33 = vpop.eup %1319 }
 0x9e6   :  { %587 = vrot.lane.b32.xlu0 %v1320_v33, %s1355_s11 }
 0xa58   :  { %v588_v34 = vpop.permute.xlu0 %587 }
 0xa59   :  { %v590_v35 = vmul.f32 %v1318_v27, %v588_v34 }
 0xa5b   :  { %594 = vrot.lane.b32.xlu1 %v590_v35, %s1356_s3 }
 0xacd   :  { %v595_v36 = vpop.permute.xlu1 %594 }
 0xace   :  { %1239 = vmatmul.mubr.msk.f32.vlgmr.msra.gmra.mxu0 %vm186_vm3, %v595_v36 }
 0xacf   :  { %1253 = vmatpush3.msra.mxu0 %v1399_v2  ;;  %1260 = vmatprep.mubr.msk.f32.mxu0 %vm1354_vm2, %v1353_v0 }
 0xad0   :  { %1254 = vmatprep.subr.mxu0 %v1353_v0 }
 0xad1   :  { %1255 = vmatpush3.msra.mxu0 %v1413_v5 }
 0xad2   :  { %1256 = vmatprep.subr.mxu0 %v1353_v0 }
 0xad3   :  { %1257 = vmatpush3.msra.mxu0 %v1421_v6 }
 0xad4   :  { %1258 = vmatprep.subr.mxu0 %v1353_v0 }
 0xad5   :  { %1259 = vmatpush3.msra.mxu0 %v1429_v7 }
 0xad6   :  { %1274 = vmatprep.subr.mxu0 %v1353_v0 }
 0xb8e   :  { %v664_v38 = vpop.f32.mrf.mxu0 }
 0xb8f   :  { %v668_v39 = vadd.f32 %v664_v38, %v155_v37 }
 0xb90   :  { %v1240_v40 = vpop.f32.mrf.mxu0 }
 0xb91   :  { %1321 = vtanh.f32 %v668_v39  ;;  %v1109_v42 = vmul.f32 -1.442695, %v668_v39 }
 0xb93   :  { %1323 = vpow2.f32 %v1109_v42 }
 0xb9e   :  { %v1322_v41 = vpop.eup %1321 }
 0xb9f   :  { %678 = vrot.lane.b32.xlu0 %v1322_v41, %s1355_s11 }
 0xba0   :  { %v1324_v43 = vpop.eup %1323 }
 0xba1   :  { %v672_v44 = vadd.f32 1.0, %v1324_v43  ;;  %v1001_v43 = vld [vmem:[%s1621_s4 + $0x10] sm:$0xff] }
 0xba3   :  { %1325 = vrcp.f32 %v672_v44  ;;  %v1000_v44 = vld [vmem:[%s1621_s4 + $0x8] sm:$0xff] }
 0xbb0   :  { %v1326_v45 = vpop.eup %1325 }
 0xbb1   :  { %v676_v48 = vmul.f32 %v1326_v45, %v584_v32 }
 0xc11   :  { %v679_v46 = vpop.permute.xlu0 %678 }
 0xc12   :  { %v681_v47 = vmul.f32 %v1326_v45, %v679_v46 }
 0xc14   :  { %683 = vrot.lane.b32.xlu1 %v681_v47, %s1356_s3 }
 0xc86   :  { %v684_v49 = vpop.permute.xlu1 %683 }
 0xc87   :  { %v686_v50 = vadd.f32 %v684_v49, %v676_v48 }
 0xc89   :  { %1327 = vtanh.f32 %v686_v50 }
 0xc96   :  { %v1328_v51 = vpop.eup %1327 }
 0xc97   :  { %689 = vrot.lane.b32.xlu0 %v1328_v51, %s1355_s11 }
 0xd09   :  { %v690_v52 = vpop.permute.xlu0 %689 }
 0xd0a   :  { %v692_v53 = vmul.f32 %v1326_v45, %v690_v52  ;;  %v999_v45 = vld [vmem:[%s1621_s4] sm:$0xff] }
 0xd0c   :  { %696 = vrot.lane.b32.xlu1 %v692_v53, %s1356_s3 }
 0xd7e   :  { %v697_v54 = vpop.permute.xlu1 %696 }
 0xd7f   :  { %1250 = vmatmul.mubr.msk.f32.vlgmr.msra.gmra.mxu1 %vm186_vm3, %v697_v54 }
 0xd80   :  { %1264 = vmatpush3.msra.mxu1 %v1399_v2  ;;  %1271 = vmatprep.mubr.msk.f32.mxu1 %vm1354_vm2, %v1353_v0 }
 0xd81   :  { %1265 = vmatprep.subr.mxu1 %v1353_v0 }
 0xd82   :  { %1266 = vmatpush3.msra.mxu1 %v1413_v5 }
 0xd83   :  { %1267 = vmatprep.subr.mxu1 %v1353_v0 }
 0xd84   :  { %1268 = vmatpush3.msra.mxu1 %v1421_v6 }
 0xd85   :  { %1269 = vmatprep.subr.mxu1 %v1353_v0 }
 0xd86   :  { %1270 = vmatpush3.msra.mxu1 %v1429_v7 }
 0xe3f   :  { %v766_v59 = vpop.f32.mrf.mxu1 }
 0xe40   :  { %v770_v2 = vadd.f32 %v766_v59, %v160_v56 }
 0xe41   :  { %v1251_v60 = vpop.f32.mrf.mxu1 }
 0xe42   :  { %1329 = vtanh.f32 %v770_v2  ;;  %v1111_v62 = vmul.f32 -1.442695, %v770_v2 }
 0xe44   :  { %1331 = vpow2.f32 %v1111_v62 }
 0xe4f   :  { %v1330_v61 = vpop.eup %1329 }
 0xe50   :  { %780 = vrot.lane.b32.xlu0 %v1330_v61, %s1355_s11 }
 0xe51   :  { %v1332_v5 = vpop.eup %1331 }
 0xe52   :  { %v774_v63 = vadd.f32 1.0, %v1332_v5 }
 0xe54   :  { %1333 = vrcp.f32 %v774_v63 }
 0xe61   :  { %v1334_v6 = vpop.eup %1333 }
 0xe62   :  { %v778_v7 = vmul.f32 %v1334_v6, %v686_v50  ;;  %v1116_v50 = vld [vmem:[%s1622_s5] ss:$0 sm:$0xff] }
 0xec2   :  { %v781_v1 = vpop.permute.xlu0 %780 }
 0xec3   :  { %v783_v3 = vmul.f32 %v1334_v6, %v781_v1 }
 0xec5   :  { %785 = vrot.lane.b32.xlu1 %v783_v3, %s1356_s3 }
 0xf37   :  { %v786_v4 = vpop.permute.xlu1 %785 }
 0xf38   :  { %v788_v55 = vadd.f32 %v786_v4, %v778_v7 }
 0xf3a   :  { %1335 = vtanh.f32 %v788_v55 }
 0xf47   :  { %v1336_v8 = vpop.eup %1335 }
 0xf48   :  { %791 = vrot.lane.b32.xlu0 %v1336_v8, %s1355_s11 }
 0xfba   :  { %v792_v10 = vpop.permute.xlu0 %791 }
 0xfbb   :  { %v794_v11 = vmul.f32 %v1334_v6, %v792_v10 }
 0xfbd   :  { %798 = vrot.lane.b32.xlu1 %v794_v11, %s1356_s3 }
0x102f   :  { %v799_v12 = vpop.permute.xlu1 %798 }
0x1030   :  { %1261 = vmatmul.mubr.msk.f32.vlgmr.msra.gmra.mxu0 %vm186_vm3, %v799_v12 }
0x1031   :  { %1282 = vmatprep.mubr.msk.f32.mxu0 %vm1354_vm2, %v1353_v0  ;;  %1275 = vmatpush3.msra.mxu0 %v1002_v57 }
0x1032   :  { %1276 = vmatprep.subr.mxu0 %v1353_v0 }
0x1033   :  { %1277 = vmatpush3.msra.mxu0 %v1001_v43 }
0x1034   :  { %1278 = vmatprep.subr.mxu0 %v1353_v0 }
0x1035   :  { %1279 = vmatpush3.msra.mxu0 %v1000_v44 }
0x1036   :  { %1280 = vmatprep.subr.mxu0 %v1353_v0 }
0x1037   :  { %1281 = vmatpush3.msra.mxu0 %v999_v45 }
0x10f0   :  { %v868_v14 = vpop.f32.mrf.mxu0 }
0x10f1   :  { %v872_v15 = vadd.f32 %v868_v14, %v165_v13 }
0x10f2   :  { %v1262_v16 = vpop.f32.mrf.mxu0 }
0x10f3   :  { %1337 = vtanh.f32 %v872_v15  ;;  %v1113_v18 = vmul.f32 -1.442695, %v872_v15 }
0x10f5   :  { %1339 = vpow2.f32 %v1113_v18 }
0x1100   :  { %v1338_v17 = vpop.eup %1337 }
0x1101   :  { %882 = vrot.lane.b32.xlu0 %v1338_v17, %s1355_s11 }
0x1102   :  { %v1340_v19 = vpop.eup %1339 }
0x1103   :  { %v876_v20 = vadd.f32 1.0, %v1340_v19 }
0x1105   :  { %1341 = vrcp.f32 %v876_v20 }
0x1112   :  { %v1342_v21 = vpop.eup %1341 }
0x1113   :  { %v880_v24 = vmul.f32 %v1342_v21, %v788_v55 }
0x1173   :  { %v883_v22 = vpop.permute.xlu0 %882 }
0x1174   :  { %v885_v23 = vmul.f32 %v1342_v21, %v883_v22 }
0x1176   :  { %887 = vrot.lane.b32.xlu1 %v885_v23, %s1356_s3 }
0x11e8   :  { %v888_v25 = vpop.permute.xlu1 %887 }
0x11e9   :  { %v890_v58 = vadd.f32 %v888_v25, %v880_v24 }
0x11eb   :  { %1343 = vtanh.f32 %v890_v58 }
0x11f8   :  { %v1344_v26 = vpop.eup %1343 }
0x11f9   :  { %893 = vrot.lane.b32.xlu0 %v1344_v26, %s1355_s11 }
0x126b   :  { %v894_v27 = vpop.permute.xlu0 %893 }
0x126c   :  { %v896_v28 = vmul.f32 %v1342_v21, %v894_v27 }
0x126e   :  { %900 = vrot.lane.b32.xlu1 %v896_v28, %s1356_s3 }
0x12e0   :  { %v901_v29 = vpop.permute.xlu1 %900 }
0x12e1   :  { %1272 = vmatmul.mubr.msk.f32.vlgmr.msra.gmra.mxu1 %vm186_vm3, %v901_v29 }
0x13a1   :  { %v970_v31 = vpop.f32.mrf.mxu1 }
0x13a2   :  { %v974_v32 = vadd.f32 %v970_v31, %v170_v30 }
0x13a3   :  { %v1273_v33 = vpop.f32.mrf.mxu1 }
0x13a4   :  { %1345 = vtanh.f32 %v974_v32  ;;  %v1115_v35 = vmul.f32 -1.442695, %v974_v32 }
0x13a6   :  { %1347 = vpow2.f32 %v1115_v35 }
0x13b1   :  { %v1346_v34 = vpop.eup %1345 }
0x13b2   :  { %984 = vrot.lane.b32.xlu0 %v1346_v34, %s1355_s11 }
0x13b3   :  { %v1348_v36 = vpop.eup %1347 }
0x13b4   :  { %v978_v37 = vadd.f32 1.0, %v1348_v36 }
0x13b6   :  { %1349 = vrcp.f32 %v978_v37 }
0x13c3   :  { %v1350_v38 = vpop.eup %1349 }
0x13c4   :  { %v982_v41 = vmul.f32 %v1350_v38, %v890_v58 }
0x1424   :  { %v985_v39 = vpop.permute.xlu0 %984 }
0x1425   :  { %v987_v40 = vmul.f32 %v1350_v38, %v985_v39 }
0x1427   :  { %989 = vrot.lane.b32.xlu1 %v987_v40, %s1356_s3 }
0x1499   :  { %v990_v42 = vpop.permute.xlu1 %989 }
0x149a   :  { %v992_v9 = vadd.f32 %v990_v42, %v982_v41 }
0x149c   :  { %1351 = vtanh.f32 %v992_v9 }
0x14a9   :  { %v1352_v46 = vpop.eup %1351 }
0x14aa   :  { %995 = vrot.lane.b32.xlu0 %v1352_v46, %s1355_s11 }
0x151c   :  { %v996_v47 = vpop.permute.xlu0 %995 }
0x151d   :  { %v998_v48 = vmul.f32 %v1350_v38, %v996_v47 }
0x151f   :  { %1011 = vrot.lane.b32.xlu1 %v998_v48, %s1356_s3 }
0x1591   :  { %v1012_v49 = vpop.permute.xlu1 %1011 }
0x1592   :  { %1283 = vmatmul.mubr.msk.f32.vlgmr.msra.gmra.mxu0 %vm186_vm3, %v1012_v49 }
0x1652   :  { %v1081_v51 = vpop.f32.mrf.mxu0 }
0x1653   :  { %v1082_v52 = vadd.f32 %v1116_v50, %v1081_v51 }
0x1654   :  { %v1284_v53 = vpop.f32.mrf.mxu0 }
0x1655   :  { %1086 = vst.msk [vmem:[%s1623_s6] sm:$0xff] %vm1085_vm4, %v1082_v52 }

</bundles_post_ra>
